<compile_context>
chip_gen: v7x
topology: tpu7x:2x2x1
jax: 0.10.0
libtpu: 0.0.40
codegen_flags: <defaults>
</compile_context>

<pallas_src>
import math
from functools import partial

import jax
import jax.numpy as jnp
from jax import lax
from jax.experimental import pallas as pl
from jax.experimental.pallas import tpu as pltpu

NEG_INF = -1e9  # additive mask value (stands in for -inf, numerically safe in f32)
LN_EPS = 1e-5


def _round_up(x, m):
    return ((x + m - 1) // m) * m


# --------------------------------------------------------------------------
# Kernel 1: fused MHA sublayer  (QKV proj + attention + out proj + residual + LN)
# --------------------------------------------------------------------------
def _mha_ln_kernel(xq_ref, xkv_ref, wq_ref, bq_ref, wk_ref, bk_ref, wv_ref, bv_ref,
                   wo_ref, bo_ref, am_ref, kpm_ref, g_ref, beta_ref,
                   o_ref, acc_ref, *, scale, eps):
    h = pl.program_id(1)

    @pl.when(h == 0)
    def _():
        acc_ref[...] = jnp.zeros_like(acc_ref)

    x = xq_ref[0]                                   # (Sq, E) f32 (query input / residual)
    xkv = xkv_ref[0]                                # (Sk, E) f32
    xb = x.astype(jnp.bfloat16)
    xkvb = xkv.astype(jnp.bfloat16)

    # Per-head projections (weights pre-split per head via BlockSpec): bf16 MXU, f32 acc.
    q = jnp.dot(xb, wq_ref[0], preferred_element_type=jnp.float32) + bq_ref[0]     # (Sq, Dh)
    k = jnp.dot(xkvb, wk_ref[0], preferred_element_type=jnp.float32) + bk_ref[0]   # (Sk, Dh)
    v = jnp.dot(xkvb, wv_ref[0], preferred_element_type=jnp.float32) + bv_ref[0]   # (Sk, Dh)

    # Scores: (Sq, Dh) x (Sk, Dh)^T  (NT contraction, no explicit transpose)
    s = lax.dot_general((q * scale).astype(jnp.bfloat16), k.astype(jnp.bfloat16),
                        (((1,), (1,)), ((), ())),
                        preferred_element_type=jnp.float32)                         # (Sq, Sk)
    # Additive mask built in-kernel: shared attn mask + this batch's key-padding mask.
    s = s + am_ref[...] + kpm_ref[0]
    s = s - jnp.max(s, axis=-1, keepdims=True)
    p = jnp.exp(s)
    p = p * pl.reciprocal(jnp.sum(p, axis=-1, keepdims=True), approx=True)

    oh = jnp.dot(p.astype(jnp.bfloat16), v.astype(jnp.bfloat16),
                 preferred_element_type=jnp.float32)                                # (Sq, Dh)
    # Per-head slice of the output projection, accumulated over heads in VMEM.
    acc_ref[...] += jnp.dot(oh.astype(jnp.bfloat16), wo_ref[0],
                            preferred_element_type=jnp.float32)                     # (Sq, E)

    @pl.when(h == pl.num_programs(1) - 1)
    def _():
        y = acc_ref[...] + bo_ref[...] + x          # out-proj bias + residual (f32)
        mean = jnp.mean(y, axis=-1, keepdims=True)
        yc = y - mean
        var = jnp.mean(yc * yc, axis=-1, keepdims=True)
        o_ref[0] = (yc * lax.rsqrt(var + eps)) * g_ref[...] + beta_ref[...]


def fused_mha_ln(x_q, x_kv, p, nhead, attn_mask, kpm_add, gamma, beta):
    """x_q: (N, Sq, E), x_kv: (N, Sk, E).  Returns LayerNorm(x_q + MHA(x_q, x_kv))."""
    N, Sq, E = x_q.shape
    Sk = x_kv.shape[1]
    Dh = E // nhead
    scale = 1.0 / math.sqrt(Dh)
    if attn_mask is None:
        attn_mask = jnp.zeros((Sq, Sk), jnp.float32)

    return pl.pallas_call(
        partial(_mha_ln_kernel, scale=scale, eps=LN_EPS),
        out_shape=jax.ShapeDtypeStruct((N, Sq, E), jnp.float32),
        grid=(N, nhead),
        in_specs=[
            pl.BlockSpec((1, Sq, E), lambda n, h: (n, 0, 0)),    # x_q (resident over h)
            pl.BlockSpec((1, Sk, E), lambda n, h: (n, 0, 0)),    # x_kv
            pl.BlockSpec((1, E, Dh), lambda n, h: (h, 0, 0)),    # wq per head
            pl.BlockSpec((1, 1, Dh), lambda n, h: (h, 0, 0)),    # bq per head
            pl.BlockSpec((1, E, Dh), lambda n, h: (h, 0, 0)),    # wk per head
            pl.BlockSpec((1, 1, Dh), lambda n, h: (h, 0, 0)),    # bk per head
            pl.BlockSpec((1, E, Dh), lambda n, h: (h, 0, 0)),    # wv per head
            pl.BlockSpec((1, 1, Dh), lambda n, h: (h, 0, 0)),    # bv per head
            pl.BlockSpec((1, Dh, E), lambda n, h: (h, 0, 0)),    # wo per head
            pl.BlockSpec((1, E), lambda n, h: (0, 0)),           # bo
            pl.BlockSpec((Sq, Sk), lambda n, h: (0, 0)),         # shared additive attn mask
            pl.BlockSpec((1, 1, Sk), lambda n, h: (n, 0, 0)),    # per-batch key-padding (additive)
            pl.BlockSpec((1, E), lambda n, h: (0, 0)),           # LN gamma
            pl.BlockSpec((1, E), lambda n, h: (0, 0)),           # LN beta
        ],
        out_specs=pl.BlockSpec((1, Sq, E), lambda n, h: (n, 0, 0)),
        scratch_shapes=[pltpu.VMEM((Sq, E), jnp.float32)],
        compiler_params=pltpu.CompilerParams(
            dimension_semantics=("parallel", "arbitrary")),
    )(x_q, x_kv, p["wq_h"], p["bq_h"], p["wk_h"], p["bk_h"], p["wv_h"], p["bv_h"],
      p["wo_h"], p["bo"], attn_mask, kpm_add, gamma, beta)


# --------------------------------------------------------------------------
# Kernel 2: fused FFN sublayer  (linear1 + ReLU + linear2 + residual + LN)
# --------------------------------------------------------------------------
def _ffn_ln_kernel(x_ref, w1_ref, b1_ref, w2_ref, b2_ref, g_ref, beta_ref, o_ref, *, eps):
    x = x_ref[0]                                                     # (S, E) f32
    hid = jnp.dot(x.astype(jnp.bfloat16), w1_ref[...],
                  preferred_element_type=jnp.float32) + b1_ref[...]  # (S, FF)
    hid = jnp.maximum(hid, 0.0)
    y = jnp.dot(hid.astype(jnp.bfloat16), w2_ref[...],
                preferred_element_type=jnp.float32) + b2_ref[...]    # (S, E)
    y = y + x                                                        # residual
    mean = jnp.mean(y, axis=-1, keepdims=True)
    yc = y - mean
    var = jnp.mean(yc * yc, axis=-1, keepdims=True)
    o_ref[0] = (yc * lax.rsqrt(var + eps)) * g_ref[...] + beta_ref[...]


def fused_ffn_ln(x, p, gamma, beta):
    N, S, E = x.shape
    FF = p["w1"].shape[1]
    return pl.pallas_call(
        partial(_ffn_ln_kernel, eps=LN_EPS),
        out_shape=jax.ShapeDtypeStruct((N, S, E), jnp.float32),
        grid=(N,),
        in_specs=[
            pl.BlockSpec((1, S, E), lambda n: (n, 0, 0)),
            pl.BlockSpec((E, FF), lambda n: (0, 0)),
            pl.BlockSpec((1, FF), lambda n: (0, 0)),
            pl.BlockSpec((FF, E), lambda n: (0, 0)),
            pl.BlockSpec((1, E), lambda n: (0, 0)),
            pl.BlockSpec((1, E), lambda n: (0, 0)),
            pl.BlockSpec((1, E), lambda n: (0, 0)),
        ],
        out_specs=pl.BlockSpec((1, S, E), lambda n: (n, 0, 0)),
        compiler_params=pltpu.CompilerParams(dimension_semantics=("parallel",)),
    )(x, p["w1"], p["b1"], p["w2"], p["b2"], gamma, beta)


# --------------------------------------------------------------------------
# Kernel 3: gridded (M, N, K) linear with f32 accumulator (vocab projection)
# --------------------------------------------------------------------------
def _tiled_linear_kernel(x_ref, w_ref, b_ref, o_ref, acc_ref):
    k = pl.program_id(2)

    @pl.when(k == 0)
    def _():
        acc_ref[...] = jnp.zeros_like(acc_ref)

    acc_ref[...] += jnp.dot(x_ref[...], w_ref[...], preferred_element_type=jnp.float32)

    @pl.when(k == pl.num_programs(2) - 1)
    def _():
        o_ref[...] = (acc_ref[...] + b_ref[...]).astype(o_ref.dtype)


def pallas_linear_tiled(x, w, b, tm=256, tn=512, tk=512):
    """x: (M, K) bf16, w: (K, N) bf16, b: (N,) f32 -> (M, N) f32.
    Tiles sized for v7x's 32 MiB scoped VMEM with double buffering; pads small
    dims up to (8, 128)-aligned tiles and slices the result back."""
    M, K = x.shape
    N = w.shape[1]
    tm = min(tm, _round_up(M, 8))
    tn = min(tn, _round_up(N, 128))
    tk = min(tk, _round_up(K, 128))
    Mp, Kp, Np = _round_up(M, tm), _round_up(K, tk), _round_up(N, tn)
    xp = jnp.pad(x, ((0, Mp - M), (0, Kp - K)))
    wp = jnp.pad(w, ((0, Kp - K), (0, Np - N)))
    bp = jnp.pad(b.reshape(1, N), ((0, 0), (0, Np - N)))
    out = pl.pallas_call(
        _tiled_linear_kernel,
        out_shape=jax.ShapeDtypeStruct((Mp, Np), jnp.float32),
        grid=(Mp // tm, Np // tn, Kp // tk),
        in_specs=[
            pl.BlockSpec((tm, tk), lambda i, j, k: (i, k)),
            pl.BlockSpec((tk, tn), lambda i, j, k: (k, j)),
            pl.BlockSpec((1, tn), lambda i, j, k: (0, j)),
        ],
        out_specs=pl.BlockSpec((tm, tn), lambda i, j, k: (i, j)),
        scratch_shapes=[pltpu.VMEM((tm, tn), jnp.float32)],
        compiler_params=pltpu.CompilerParams(
            dimension_semantics=("parallel", "parallel", "arbitrary")),
    )(xp, wp, bp)
    return out[:M, :N]


# --------------------------------------------------------------------------
# Model building blocks (glue around the kernels)
# --------------------------------------------------------------------------
def encoder_layer(x, p, nhead, src_mask, src_kpm_add):
    # post-norm (norm_first=False); dropout = identity (eval)
    x = fused_mha_ln(x, x, p["self_attn"], nhead, src_mask, src_kpm_add,
                     p["norm1_g"], p["norm1_b"])
    x = fused_ffn_ln(x, p["ff"], p["norm2_g"], p["norm2_b"])
    return x


def decoder_layer(x, memory, p, nhead, tgt_mask, mem_mask, tgt_kpm_add, mem_kpm_add):
    x = fused_mha_ln(x, x, p["self_attn"], nhead, tgt_mask, tgt_kpm_add,
                     p["norm1_g"], p["norm1_b"])
    x = fused_mha_ln(x, memory, p["cross_attn"], nhead, mem_mask, mem_kpm_add,
                     p["norm2_g"], p["norm2_b"])
    x = fused_ffn_ln(x, p["ff"], p["norm3_g"], p["norm3_b"])
    return x


def token_embedding(tokens, table, embedding_size):
    # nn.Embedding(padding_idx) -> pad row of `table` is zero; then * sqrt(E)
    return jnp.take(table, tokens, axis=0) * math.sqrt(embedding_size)


def positional_encoding(x, pe_table):
    S = x.shape[0]
    return x + pe_table[:S]  # dropout = identity (eval)


def _kpm_to_additive(kpm_bool):
    # (N, S) bool -> (N, 1, S) additive f32
    return jnp.where(kpm_bool, NEG_INF, 0.0).astype(jnp.float32)[:, None, :]


def seq2seq_transformer_forward(params, src, tgt, mask_src, mask_tgt,
                                padding_mask_src, padding_mask_tgt,
                                memory_key_padding_mask):
    E = params["embedding_size"]
    nhead = params["nhead"]
    S_src, N = src.shape
    S_tgt = tgt.shape[0]

    src_kpm_add = _kpm_to_additive(padding_mask_src)
    tgt_kpm_add = _kpm_to_additive(padding_mask_tgt)
    mem_kpm_add = _kpm_to_additive(memory_key_padding_mask)

    # Embedding + positional encoding (seq-first), then switch to batch-first (N, S, E)
    emb_src = positional_encoding(token_embedding(src, params["emb_src"], E), params["pe"])
    memory = jnp.transpose(emb_src, (1, 0, 2))
    for lp in params["encoder_layers"]:
        memory = encoder_layer(memory, lp, nhead, mask_src, src_kpm_add)

    emb_tgt = positional_encoding(token_embedding(tgt, params["emb_tgt"], E), params["pe"])
    outs = jnp.transpose(emb_tgt, (1, 0, 2))
    mem_mask = jnp.zeros((S_tgt, S_src), jnp.float32)   # memory_mask=None in the reference
    for lp in params["decoder_layers"]:
        outs = decoder_layer(outs, memory, lp, nhead, mask_tgt, mem_mask,
                             tgt_kpm_add, mem_kpm_add)

    # Final vocab projection with the gridded, accumulating linear kernel.
    logits = pallas_linear_tiled(
        outs.reshape(N * S_tgt, E).astype(jnp.bfloat16),
        params["out_w"], params["out_b"])
    logits = logits.reshape(N, S_tgt, params["vocab_tgt"])
    return jnp.transpose(logits, (1, 0, 2))             # (S_tgt, N, vocab) like PyTorch


# --------------------------------------------------------------------------
# Deterministic parameter init (shapes follow the PyTorch module)
# --------------------------------------------------------------------------
def _init_linear(key, fan_in, fan_out):
    kw, kb = jax.random.split(key)
    bound = 1.0 / math.sqrt(fan_in)
    w = jax.random.uniform(kw, (fan_in, fan_out), jnp.float32, -bound, bound)
    b = jax.random.uniform(kb, (fan_out,), jnp.float32, -bound, bound)
    return w, b


def _init_mha(key, E, H):
    Dh = E // H
    ks = jax.random.split(key, 4)
    wq, bq = _init_linear(ks[0], E, E)
    wk, bk = _init_linear(ks[1], E, E)
    wv, bv = _init_linear(ks[2], E, E)
    wo, bo = _init_linear(ks[3], E, E)
    # Pre-split weights per head so the kernel's BlockSpec can slice them:
    #   wq_h[h] = wq[:, h*Dh:(h+1)*Dh]   wo_h[h] = wo[h*Dh:(h+1)*Dh, :]
    return dict(
        wq_h=jnp.transpose(wq.reshape(E, H, Dh), (1, 0, 2)).astype(jnp.bfloat16),
        bq_h=bq.reshape(H, 1, Dh),
        wk_h=jnp.transpose(wk.reshape(E, H, Dh), (1, 0, 2)).astype(jnp.bfloat16),
        bk_h=bk.reshape(H, 1, Dh),
        wv_h=jnp.transpose(wv.reshape(E, H, Dh), (1, 0, 2)).astype(jnp.bfloat16),
        bv_h=bv.reshape(H, 1, Dh),
        wo_h=wo.reshape(H, Dh, E).astype(jnp.bfloat16),
        bo=bo.reshape(1, E),
    )


def _init_ff(key, E, FF):
    k1, k2 = jax.random.split(key)
    w1, b1 = _init_linear(k1, E, FF)
    w2, b2 = _init_linear(k2, FF, E)
    return dict(w1=w1.astype(jnp.bfloat16), b1=b1.reshape(1, FF),
                w2=w2.astype(jnp.bfloat16), b2=b2.reshape(1, E))


def make_positional_table(embedding_size, maxlen=512):
    den = jnp.exp(
        -jnp.arange(0, embedding_size, 2, dtype=jnp.float32)
        * math.log(10000.0) / embedding_size)
    pos = jnp.arange(0, maxlen, dtype=jnp.float32).reshape(maxlen, 1)
    pe = jnp.zeros((maxlen, embedding_size), jnp.float32)
    pe = pe.at[:, 0::2].set(jnp.sin(pos * den))
    pe = pe.at[:, 1::2].set(jnp.cos(pos * den))
    return pe.reshape(maxlen, 1, embedding_size)  # (maxlen, 1, E), broadcasts over N


def init_params(key, num_encoder_layers, num_decoder_layers, embedding_size,
                vocab_size_src, vocab_size_tgt, pad_idx, dim_feedforward, nhead):
    keys = iter(jax.random.split(key, 64))
    E = embedding_size

    emb_src = jax.random.normal(next(keys), (vocab_size_src, E), jnp.float32)
    emb_src = emb_src.at[pad_idx].set(0.0)
    emb_tgt = jax.random.normal(next(keys), (vocab_size_tgt, E), jnp.float32)
    emb_tgt = emb_tgt.at[pad_idx].set(0.0)

    enc_layers = []
    for _ in range(num_encoder_layers):
        enc_layers.append(dict(
            self_attn=_init_mha(next(keys), E, nhead),
            ff=_init_ff(next(keys), E, dim_feedforward),
            norm1_g=jnp.ones((1, E), jnp.float32), norm1_b=jnp.zeros((1, E), jnp.float32),
            norm2_g=jnp.ones((1, E), jnp.float32), norm2_b=jnp.zeros((1, E), jnp.float32),
        ))

    dec_layers = []
    for _ in range(num_decoder_layers):
        dec_layers.append(dict(
            self_attn=_init_mha(next(keys), E, nhead),
            cross_attn=_init_mha(next(keys), E, nhead),
            ff=_init_ff(next(keys), E, dim_feedforward),
            norm1_g=jnp.ones((1, E), jnp.float32), norm1_b=jnp.zeros((1, E), jnp.float32),
            norm2_g=jnp.ones((1, E), jnp.float32), norm2_b=jnp.zeros((1, E), jnp.float32),
            norm3_g=jnp.ones((1, E), jnp.float32), norm3_b=jnp.zeros((1, E), jnp.float32),
        ))

    out_w, out_b = _init_linear(next(keys), E, vocab_size_tgt)

    return dict(
        embedding_size=E, nhead=nhead, vocab_tgt=vocab_size_tgt,
        emb_src=emb_src, emb_tgt=emb_tgt, pe=make_positional_table(E),
        encoder_layers=enc_layers, decoder_layers=dec_layers,
        out_w=out_w.astype(jnp.bfloat16), out_b=out_b,
    )


# --------------------------------------------------------------------------
# Main
# --------------------------------------------------------------------------
if __name__ == "__main__":
    # Small, module-consistent shapes.
    NUM_ENC, NUM_DEC = 2, 2
    EMB = 64
    NHEAD = 8
    FF = 128
    VOCAB_SRC, VOCAB_TGT = 50, 56
    PAD_IDX = 1
    S_SRC, S_TGT, N = 10, 8, 2

    key = jax.random.PRNGKey(0)
    k_param, k_src, k_tgt = jax.random.split(key, 3)

    params = init_params(k_param, NUM_ENC, NUM_DEC, EMB, VOCAB_SRC, VOCAB_TGT,
                         PAD_IDX, FF, NHEAD)

    # Token inputs, seq-first (S, N)
    src = jax.random.randint(k_src, (S_SRC, N), 2, VOCAB_SRC, dtype=jnp.int32)
    tgt = jax.random.randint(k_tgt, (S_TGT, N), 2, VOCAB_TGT, dtype=jnp.int32)
    # Pad the tail of batch element 1.
    src = src.at[-2:, 1].set(PAD_IDX)
    tgt = tgt.at[-1:, 1].set(PAD_IDX)

    # Masks (PyTorch conventions: additive float attn masks, bool key-padding masks)
    mask_src = jnp.zeros((S_SRC, S_SRC), jnp.float32)
    causal = jnp.triu(jnp.ones((S_TGT, S_TGT), jnp.float32), k=1)
    mask_tgt = causal * NEG_INF
    padding_mask_src = (src.T == PAD_IDX)           # (N, S_src) bool
    padding_mask_tgt = (tgt.T == PAD_IDX)           # (N, S_tgt) bool
    memory_key_padding_mask = padding_mask_src      # (N, S_src) bool

    # TODO(synk): dropout is treated as eval-mode identity (no RNG in forward).
    logits = seq2seq_transformer_forward(
        params, src, tgt, mask_src, mask_tgt,
        padding_mask_src, padding_mask_tgt, memory_key_padding_mask)
    logits = jax.block_until_ready(logits)

    assert logits.shape == (S_TGT, N, VOCAB_TGT)
    assert bool(jnp.all(jnp.isfinite(logits)))
    print("KERNEL_OK")
</pallas_src>

<mosaic_0001>
module attributes {stable_mosaic.version = 11 : i64} {
  func.func @_mha_ln_kernel(%arg0: i32, %arg1: i32, %arg2: memref<1x10x64xf32, #tpu.memory_space<vmem>>, %arg3: memref<1x10x64xf32, #tpu.memory_space<vmem>>, %arg4: memref<1x64x8xbf16, #tpu.memory_space<vmem>>, %arg5: memref<1x1x8xf32, #tpu.memory_space<vmem>>, %arg6: memref<1x64x8xbf16, #tpu.memory_space<vmem>>, %arg7: memref<1x1x8xf32, #tpu.memory_space<vmem>>, %arg8: memref<1x64x8xbf16, #tpu.memory_space<vmem>>, %arg9: memref<1x1x8xf32, #tpu.memory_space<vmem>>, %arg10: memref<1x8x64xbf16, #tpu.memory_space<vmem>>, %arg11: memref<1x64xf32, #tpu.memory_space<vmem>>, %arg12: memref<10x10xf32, #tpu.memory_space<vmem>>, %arg13: memref<1x1x10xf32, #tpu.memory_space<vmem>>, %arg14: memref<1x64xf32, #tpu.memory_space<vmem>>, %arg15: memref<1x64xf32, #tpu.memory_space<vmem>>, %arg16: memref<1x10x64xf32, #tpu.memory_space<vmem>>, %arg17: memref<10x64xf32, #tpu.memory_space<vmem>>) attributes {dimension_semantics = [#tpu.dimension_semantics<parallel>, #tpu.dimension_semantics<arbitrary>], iteration_bounds = array<i64: 2, 8>, scalar_prefetch = 0 : i64, scratch_operands = 1 : i64, tpu.core_type = #tpu.core_type<tc>, window_params = [{transform_indices = @transform_0, window_bounds = array<i64: 1, 10, 64>}, {transform_indices = @transform_1, window_bounds = array<i64: 1, 10, 64>}, {transform_indices = @transform_2, window_bounds = array<i64: 1, 64, 8>}, {transform_indices = @transform_3, window_bounds = array<i64: 1, 1, 8>}, {transform_indices = @transform_4, window_bounds = array<i64: 1, 64, 8>}, {transform_indices = @transform_5, window_bounds = array<i64: 1, 1, 8>}, {transform_indices = @transform_6, window_bounds = array<i64: 1, 64, 8>}, {transform_indices = @transform_7, window_bounds = array<i64: 1, 1, 8>}, {transform_indices = @transform_8, window_bounds = array<i64: 1, 8, 64>}, {pipeline_mode = #tpu.pipeline_mode<synchronous>, transform_indices = @transform_9, window_bounds = array<i64: 1, 64>}, {pipeline_mode = #tpu.pipeline_mode<synchronous>, transform_indices = @transform_10, window_bounds = array<i64: 10, 10>}, {transform_indices = @transform_11, window_bounds = array<i64: 1, 1, 10>}, {pipeline_mode = #tpu.pipeline_mode<synchronous>, transform_indices = @transform_12, window_bounds = array<i64: 1, 64>}, {pipeline_mode = #tpu.pipeline_mode<synchronous>, transform_indices = @transform_13, window_bounds = array<i64: 1, 64>}, {transform_indices = @transform_14, window_bounds = array<i64: 1, 10, 64>}]} {
    %c0_i32 = arith.constant 0 : i32
    %0 = arith.cmpi eq, %arg1, %c0_i32 : i32
    %1 = arith.extui %0 : i1 to i32
    %c0_i32_0 = arith.constant 0 : i32
    %2 = arith.cmpi ne, %1, %c0_i32_0 : i32
    scf.if %2 {
      %cst_45 = arith.constant 0.000000e+00 : f32
      %64 = vector.broadcast %cst_45 : f32 to vector<10x64xf32>
      %c0_46 = arith.constant 0 : index
      %c0_47 = arith.constant 0 : index
      %65 = vector.load %arg17[%c0_46, %c0_47] : memref<10x64xf32, #tpu.memory_space<vmem>>, vector<10x64xf32>
      tpu.vector_store %arg17[%c0_46, %c0_47], %64 {strides = array<i32>} : memref<10x64xf32, #tpu.memory_space<vmem>>, vector<10x64xf32>,
    } else {
    }
    %c0 = arith.constant 0 : index
    %c0_1 = arith.constant 0 : index
    %c0_2 = arith.constant 0 : index
    %3 = vector.load %arg2[%c0, %c0_1, %c0_2] : memref<1x10x64xf32, #tpu.memory_space<vmem>>, vector<1x10x64xf32>
    %4 = vector.shape_cast %3 : vector<1x10x64xf32> to vector<10x64xf32>
    %c0_3 = arith.constant 0 : index
    %c0_4 = arith.constant 0 : index
    %c0_5 = arith.constant 0 : index
    %5 = vector.load %arg3[%c0_3, %c0_4, %c0_5] : memref<1x10x64xf32, #tpu.memory_space<vmem>>, vector<1x10x64xf32>
    %6 = vector.shape_cast %5 : vector<1x10x64xf32> to vector<10x64xf32>
    %7 = arith.truncf %4 : vector<10x64xf32> to vector<10x64xbf16>
    %8 = arith.truncf %6 : vector<10x64xf32> to vector<10x64xbf16>
    %c0_6 = arith.constant 0 : index
    %c0_7 = arith.constant 0 : index
    %c0_8 = arith.constant 0 : index
    %9 = vector.load %arg4[%c0_6, %c0_7, %c0_8] : memref<1x64x8xbf16, #tpu.memory_space<vmem>>, vector<1x64x8xbf16>
    %10 = vector.shape_cast %9 : vector<1x64x8xbf16> to vector<64x8xbf16>
    %cst = arith.constant dense<0.000000e+00> : vector<10x8xf32>
    %11 = tpu.matmul %7, %10, %cst {dimension_numbers = #tpu.dot_dimension_numbers<[1], [0], [0], [1], [0, 0, 1, 1], [], []>} : vector<10x64xbf16>, vector<64x8xbf16>, vector<10x8xf32> -> vector<10x8xf32>
    %c0_9 = arith.constant 0 : index
    %c0_10 = arith.constant 0 : index
    %c0_11 = arith.constant 0 : index
    %12 = vector.load %arg5[%c0_9, %c0_10, %c0_11] : memref<1x1x8xf32, #tpu.memory_space<vmem>>, vector<1x1x8xf32>
    %13 = vector.shape_cast %12 : vector<1x1x8xf32> to vector<1x8xf32>
    %14 = vector.broadcast %13 : vector<1x8xf32> to vector<10x8xf32>
    %15 = arith.addf %11, %14 : vector<10x8xf32>
    %c0_12 = arith.constant 0 : index
    %c0_13 = arith.constant 0 : index
    %c0_14 = arith.constant 0 : index
    %16 = vector.load %arg6[%c0_12, %c0_13, %c0_14] : memref<1x64x8xbf16, #tpu.memory_space<vmem>>, vector<1x64x8xbf16>
    %17 = vector.shape_cast %16 : vector<1x64x8xbf16> to vector<64x8xbf16>
    %cst_15 = arith.constant dense<0.000000e+00> : vector<10x8xf32>
    %18 = tpu.matmul %8, %17, %cst_15 {dimension_numbers = #tpu.dot_dimension_numbers<[1], [0], [0], [1], [0, 0, 1, 1], [], []>} : vector<10x64xbf16>, vector<64x8xbf16>, vector<10x8xf32> -> vector<10x8xf32>
    %c0_16 = arith.constant 0 : index
    %c0_17 = arith.constant 0 : index
    %c0_18 = arith.constant 0 : index
    %19 = vector.load %arg7[%c0_16, %c0_17, %c0_18] : memref<1x1x8xf32, #tpu.memory_space<vmem>>, vector<1x1x8xf32>
    %20 = vector.shape_cast %19 : vector<1x1x8xf32> to vector<1x8xf32>
    %21 = vector.broadcast %20 : vector<1x8xf32> to vector<10x8xf32>
    %22 = arith.addf %18, %21 : vector<10x8xf32>
    %c0_19 = arith.constant 0 : index
    %c0_20 = arith.constant 0 : index
    %c0_21 = arith.constant 0 : index
    %23 = vector.load %arg8[%c0_19, %c0_20, %c0_21] : memref<1x64x8xbf16, #tpu.memory_space<vmem>>, vector<1x64x8xbf16>
    %24 = vector.shape_cast %23 : vector<1x64x8xbf16> to vector<64x8xbf16>
    %cst_22 = arith.constant dense<0.000000e+00> : vector<10x8xf32>
    %25 = tpu.matmul %8, %24, %cst_22 {dimension_numbers = #tpu.dot_dimension_numbers<[1], [0], [0], [1], [0, 0, 1, 1], [], []>} : vector<10x64xbf16>, vector<64x8xbf16>, vector<10x8xf32> -> vector<10x8xf32>
    %c0_23 = arith.constant 0 : index
    %c0_24 = arith.constant 0 : index
    %c0_25 = arith.constant 0 : index
    %26 = vector.load %arg9[%c0_23, %c0_24, %c0_25] : memref<1x1x8xf32, #tpu.memory_space<vmem>>, vector<1x1x8xf32>
    %27 = vector.shape_cast %26 : vector<1x1x8xf32> to vector<1x8xf32>
    %28 = vector.broadcast %27 : vector<1x8xf32> to vector<10x8xf32>
    %29 = arith.addf %25, %28 : vector<10x8xf32>
    %cst_26 = arith.constant 0.353553385 : f32
    %30 = vector.broadcast %cst_26 : f32 to vector<10x8xf32>
    %31 = arith.mulf %15, %30 : vector<10x8xf32>
    %32 = arith.truncf %31 : vector<10x8xf32> to vector<10x8xbf16>
    %33 = arith.truncf %22 : vector<10x8xf32> to vector<10x8xbf16>
    %cst_27 = arith.constant dense<0.000000e+00> : vector<10x10xf32>
    %34 = tpu.matmul %32, %33, %cst_27 {dimension_numbers = #tpu.dot_dimension_numbers<[1], [1], [0], [0], [0, 0, 1, 0], [], []>} : vector<10x8xbf16>, vector<10x8xbf16>, vector<10x10xf32> -> vector<10x10xf32>
    %c0_28 = arith.constant 0 : index
    %c0_29 = arith.constant 0 : index
    %35 = vector.load %arg12[%c0_28, %c0_29] : memref<10x10xf32, #tpu.memory_space<vmem>>, vector<10x10xf32>
    %36 = arith.addf %34, %35 : vector<10x10xf32>
    %c0_30 = arith.constant 0 : index
    %c0_31 = arith.constant 0 : index
    %c0_32 = arith.constant 0 : index
    %37 = vector.load %arg13[%c0_30, %c0_31, %c0_32] : memref<1x1x10xf32, #tpu.memory_space<vmem>>, vector<1x1x10xf32>
    %38 = vector.shape_cast %37 : vector<1x1x10xf32> to vector<1x10xf32>
    %39 = vector.broadcast %38 : vector<1x10xf32> to vector<10x10xf32>
    %40 = arith.addf %36, %39 : vector<10x10xf32>
    %cst_33 = arith.constant dense<0xFF800000> : vector<10xf32>
    %41 = vector.multi_reduction <maximumf>, %40, %cst_33 [1] : vector<10x10xf32> to vector<10xf32>
    %42 = vector.shape_cast %41 : vector<10xf32> to vector<10x1xf32>
    %43 = vector.broadcast %42 : vector<10x1xf32> to vector<10x10xf32>
    %44 = arith.subf %40, %43 : vector<10x10xf32>
    %45 = math.exp %44 : vector<10x10xf32>
    %cst_34 = arith.constant dense<0.000000e+00> : vector<10xf32>
    %46 = vector.multi_reduction <add>, %45, %cst_34 [1] : vector<10x10xf32> to vector<10xf32>
    %47 = vector.shape_cast %46 : vector<10xf32> to vector<10x1xf32>
    %48 = tpu.reciprocal %47 {approx = true} : vector<10x1xf32> -> vector<10x1xf32>
    %49 = vector.broadcast %48 : vector<10x1xf32> to vector<10x10xf32>
    %50 = arith.mulf %45, %49 : vector<10x10xf32>
    %51 = arith.truncf %50 : vector<10x10xf32> to vector<10x10xbf16>
    %52 = arith.truncf %29 : vector<10x8xf32> to vector<10x8xbf16>
    %cst_35 = arith.constant dense<0.000000e+00> : vector<10x8xf32>
    %53 = tpu.matmul %51, %52, %cst_35 {dimension_numbers = #tpu.dot_dimension_numbers<[1], [0], [0], [1], [0, 0, 1, 1], [], []>} : vector<10x10xbf16>, vector<10x8xbf16>, vector<10x8xf32> -> vector<10x8xf32>
    %c0_36 = arith.constant 0 : index
    %c0_37 = arith.constant 0 : index
    %54 = vector.load %arg17[%c0_36, %c0_37] : memref<10x64xf32, #tpu.memory_space<vmem>>, vector<10x64xf32>
    %55 = arith.truncf %53 : vector<10x8xf32> to vector<10x8xbf16>
    %c0_38 = arith.constant 0 : index
    %c0_39 = arith.constant 0 : index
    %c0_40 = arith.constant 0 : index
    %56 = vector.load %arg10[%c0_38, %c0_39, %c0_40] : memref<1x8x64xbf16, #tpu.memory_space<vmem>>, vector<1x8x64xbf16>
    %57 = vector.shape_cast %56 : vector<1x8x64xbf16> to vector<8x64xbf16>
    %cst_41 = arith.constant dense<0.000000e+00> : vector<10x64xf32>
    %58 = tpu.matmul %55, %57, %cst_41 {dimension_numbers = #tpu.dot_dimension_numbers<[1], [0], [0], [1], [0, 0, 1, 1], [], []>} : vector<10x8xbf16>, vector<8x64xbf16>, vector<10x64xf32> -> vector<10x64xf32>
    %59 = arith.addf %54, %58 : vector<10x64xf32>
    %c0_42 = arith.constant 0 : index
    %c0_43 = arith.constant 0 : index
    %60 = vector.load %arg17[%c0_42, %c0_43] : memref<10x64xf32, #tpu.memory_space<vmem>>, vector<10x64xf32>
    tpu.vector_store %arg17[%c0_42, %c0_43], %59 {strides = array<i32>} : memref<10x64xf32, #tpu.memory_space<vmem>>, vector<10x64xf32>,
    %c7_i32 = arith.constant 7 : i32
    %61 = arith.cmpi eq, %arg1, %c7_i32 : i32
    %62 = arith.extui %61 : i1 to i32
    %c0_i32_44 = arith.constant 0 : i32
    %63 = arith.cmpi ne, %62, %c0_i32_44 : i32
    scf.if %63 {
      %c0_45 = arith.constant 0 : index
      %c0_46 = arith.constant 0 : index
      %64 = vector.load %arg17[%c0_45, %c0_46] : memref<10x64xf32, #tpu.memory_space<vmem>>, vector<10x64xf32>
      %c0_47 = arith.constant 0 : index
      %c0_48 = arith.constant 0 : index
      %65 = vector.load %arg11[%c0_47, %c0_48] : memref<1x64xf32, #tpu.memory_space<vmem>>, vector<1x64xf32>
      %66 = vector.broadcast %65 : vector<1x64xf32> to vector<10x64xf32>
      %67 = arith.addf %64, %66 : vector<10x64xf32>
      %68 = arith.addf %67, %4 : vector<10x64xf32>
      %cst_49 = arith.constant dense<0.000000e+00> : vector<10xf32>
      %69 = vector.multi_reduction <add>, %68, %cst_49 [1] : vector<10x64xf32> to vector<10xf32>
      %70 = vector.shape_cast %69 : vector<10xf32> to vector<10x1xf32>
      %cst_50 = arith.constant 6.400000e+01 : f32
      %71 = vector.broadcast %cst_50 : f32 to vector<10x1xf32>
      %72 = arith.divf %70, %71 : vector<10x1xf32>
      %73 = vector.broadcast %72 : vector<10x1xf32> to vector<10x64xf32>
      %74 = arith.subf %68, %73 : vector<10x64xf32>
      %75 = arith.mulf %74, %74 : vector<10x64xf32>
      %cst_51 = arith.constant dense<0.000000e+00> : vector<10xf32>
      %76 = vector.multi_reduction <add>, %75, %cst_51 [1] : vector<10x64xf32> to vector<10xf32>
      %77 = vector.shape_cast %76 : vector<10xf32> to vector<10x1xf32>
      %cst_52 = arith.constant 6.400000e+01 : f32
      %78 = vector.broadcast %cst_52 : f32 to vector<10x1xf32>
      %79 = arith.divf %77, %78 : vector<10x1xf32>
      %cst_53 = arith.constant 9.99999974E-6 : f32
      %80 = vector.broadcast %cst_53 : f32 to vector<10x1xf32>
      %81 = arith.addf %79, %80 : vector<10x1xf32>
      %82 = math.rsqrt %81 : vector<10x1xf32>
      %83 = vector.broadcast %82 : vector<10x1xf32> to vector<10x64xf32>
      %84 = arith.mulf %74, %83 : vector<10x64xf32>
      %c0_54 = arith.constant 0 : index
      %c0_55 = arith.constant 0 : index
      %85 = vector.load %arg14[%c0_54, %c0_55] : memref<1x64xf32, #tpu.memory_space<vmem>>, vector<1x64xf32>
      %86 = vector.broadcast %85 : vector<1x64xf32> to vector<10x64xf32>
      %87 = arith.mulf %84, %86 : vector<10x64xf32>
      %c0_56 = arith.constant 0 : index
      %c0_57 = arith.constant 0 : index
      %88 = vector.load %arg15[%c0_56, %c0_57] : memref<1x64xf32, #tpu.memory_space<vmem>>, vector<1x64xf32>
      %89 = vector.broadcast %88 : vector<1x64xf32> to vector<10x64xf32>
      %90 = arith.addf %87, %89 : vector<10x64xf32>
      %c0_58 = arith.constant 0 : index
      %c0_59 = arith.constant 0 : index
      %c0_60 = arith.constant 0 : index
      %91 = vector.load %arg16[%c0_58, %c0_59, %c0_60] : memref<1x10x64xf32, #tpu.memory_space<vmem>>, vector<1x10x64xf32>
      %92 = vector.shape_cast %91 : vector<1x10x64xf32> to vector<10x64xf32>
      %93 = vector.shape_cast %90 : vector<10x64xf32> to vector<1x10x64xf32>
      tpu.vector_store %arg16[%c0_58, %c0_59, %c0_60], %93 {strides = array<i32>} : memref<1x10x64xf32, #tpu.memory_space<vmem>>, vector<1x10x64xf32>,
    } else {
    }
    return
  }
  func.func @transform_0(%arg0: i32, %arg1: i32) -> (i32, i32, i32) {
    %c0_i32 = arith.constant 0 : i32
    %c0_i32_0 = arith.constant 0 : i32
    %c0_i32_1 = arith.constant 0 : i32
    return %arg0, %c0_i32, %c0_i32_0 : i32, i32, i32
  }
  func.func @transform_1(%arg0: i32, %arg1: i32) -> (i32, i32, i32) {
    %c0_i32 = arith.constant 0 : i32
    %c0_i32_0 = arith.constant 0 : i32
    %c0_i32_1 = arith.constant 0 : i32
    return %arg0, %c0_i32, %c0_i32_0 : i32, i32, i32
  }
  func.func @transform_2(%arg0: i32, %arg1: i32) -> (i32, i32, i32) {
    %c0_i32 = arith.constant 0 : i32
    %c0_i32_0 = arith.constant 0 : i32
    %c0_i32_1 = arith.constant 0 : i32
    return %arg1, %c0_i32, %c0_i32_0 : i32, i32, i32
  }
  func.func @transform_3(%arg0: i32, %arg1: i32) -> (i32, i32, i32) {
    %c0_i32 = arith.constant 0 : i32
    %c0_i32_0 = arith.constant 0 : i32
    %c0_i32_1 = arith.constant 0 : i32
    return %arg1, %c0_i32, %c0_i32_0 : i32, i32, i32
  }
  func.func @transform_4(%arg0: i32, %arg1: i32) -> (i32, i32, i32) {
    %c0_i32 = arith.constant 0 : i32
    %c0_i32_0 = arith.constant 0 : i32
    %c0_i32_1 = arith.constant 0 : i32
    return %arg1, %c0_i32, %c0_i32_0 : i32, i32, i32
  }
  func.func @transform_5(%arg0: i32, %arg1: i32) -> (i32, i32, i32) {
    %c0_i32 = arith.constant 0 : i32
    %c0_i32_0 = arith.constant 0 : i32
    %c0_i32_1 = arith.constant 0 : i32
    return %arg1, %c0_i32, %c0_i32_0 : i32, i32, i32
  }
  func.func @transform_6(%arg0: i32, %arg1: i32) -> (i32, i32, i32) {
    %c0_i32 = arith.constant 0 : i32
    %c0_i32_0 = arith.constant 0 : i32
    %c0_i32_1 = arith.constant 0 : i32
    return %arg1, %c0_i32, %c0_i32_0 : i32, i32, i32
  }
  func.func @transform_7(%arg0: i32, %arg1: i32) -> (i32, i32, i32) {
    %c0_i32 = arith.constant 0 : i32
    %c0_i32_0 = arith.constant 0 : i32
    %c0_i32_1 = arith.constant 0 : i32
    return %arg1, %c0_i32, %c0_i32_0 : i32, i32, i32
  }
  func.func @transform_8(%arg0: i32, %arg1: i32) -> (i32, i32, i32) {
    %c0_i32 = arith.constant 0 : i32
    %c0_i32_0 = arith.constant 0 : i32
    %c0_i32_1 = arith.constant 0 : i32
    return %arg1, %c0_i32, %c0_i32_0 : i32, i32, i32
  }
  func.func @transform_9(%arg0: i32, %arg1: i32) -> (i32, i32) {
    %c0_i32 = arith.constant 0 : i32
    %c0_i32_0 = arith.constant 0 : i32
    %c0_i32_1 = arith.constant 0 : i32
    return %c0_i32, %c0_i32_0 : i32, i32
  }
  func.func @transform_10(%arg0: i32, %arg1: i32) -> (i32, i32) {
    %c0_i32 = arith.constant 0 : i32
    %c0_i32_0 = arith.constant 0 : i32
    %c0_i32_1 = arith.constant 0 : i32
    return %c0_i32, %c0_i32_0 : i32, i32
  }
  func.func @transform_11(%arg0: i32, %arg1: i32) -> (i32, i32, i32) {
    %c0_i32 = arith.constant 0 : i32
    %c0_i32_0 = arith.constant 0 : i32
    %c0_i32_1 = arith.constant 0 : i32
    return %arg0, %c0_i32, %c0_i32_0 : i32, i32, i32
  }
  func.func @transform_12(%arg0: i32, %arg1: i32) -> (i32, i32) {
    %c0_i32 = arith.constant 0 : i32
    %c0_i32_0 = arith.constant 0 : i32
    %c0_i32_1 = arith.constant 0 : i32
    return %c0_i32, %c0_i32_0 : i32, i32
  }
  func.func @transform_13(%arg0: i32, %arg1: i32) -> (i32, i32) {
    %c0_i32 = arith.constant 0 : i32
    %c0_i32_0 = arith.constant 0 : i32
    %c0_i32_1 = arith.constant 0 : i32
    return %c0_i32, %c0_i32_0 : i32, i32
  }
  func.func @transform_14(%arg0: i32, %arg1: i32) -> (i32, i32, i32) {
    %c0_i32 = arith.constant 0 : i32
    %c0_i32_0 = arith.constant 0 : i32
    %c0_i32_1 = arith.constant 0 : i32
    return %arg0, %c0_i32, %c0_i32_0 : i32, i32, i32
  }
}

</mosaic_0001>

<bundles_post_ra>
// kernel: tpu_custom_call.1
= control target key start
LH: loop header
LB: loop body
LE: loop exit
PB: predicated region body
PF: predicated region fallthrough
CT: control target
= control target key end

     0   :  { %s1628_s29 = smov 0   ;;  %s1630_s30 = smov 0   ;;  %s1843_s0 = inlined_call_operand.vmem [shape: f32[2,10,64], index: 0, kind: input, shape index: {}]   ;;  %s1844_s1 = inlined_call_operand.vmem [shape: f32[2,10,64], index: 1, kind: input, shape index: {}]   ;;  %s1845_s2 = inlined_call_operand.vmem [shape: bf16[8,64,8], index: 2, kind: input, shape index: {}]   ;;  %s1846_s3 = inlined_call_operand.vmem [shape: f32[8,1,8], index: 3, kind: input, shape index: {}]   ;;  %s1847_s4 = inlined_call_operand.vmem [shape: bf16[8,64,8], index: 4, kind: input, shape index: {}]   ;;  %s1848_s5 = inlined_call_operand.vmem [shape: f32[8,1,8], index: 5, kind: input, shape index: {}]   ;;  %s1849_s6 = inlined_call_operand.vmem [shape: bf16[8,64,8], index: 6, kind: input, shape index: {}]   ;;  %s1850_s7 = inlined_call_operand.vmem [shape: f32[8,1,8], index: 7, kind: input, shape index: {}]   ;;  %s1851_s8 = inlined_call_operand.vmem [shape: bf16[8,8,64], index: 8, kind: input, shape index: {}]   ;;  %s1852_s9 = inlined_call_operand.vmem [shape: f32[1,64], index: 9, kind: input, shape index: {}]   ;;  %s1853_s10 = inlined_call_operand.vmem [shape: f32[10,10], index: 10, kind: input, shape index: {}]   ;;  %s1854_s11 = inlined_call_operand.vmem [shape: f32[2,1,10], index: 11, kind: input, shape index: {}]   ;;  %s1855_s12 = inlined_call_operand.vmem [shape: f32[1,64], index: 12, kind: input, shape index: {}]   ;;  %s1856_s13 = inlined_call_operand.vmem [shape: f32[1,64], index: 13, kind: input, shape index: {}]   ;;  %s1857_s14 = inlined_call_operand.vmem [shape: f32[2,10,64], index: 14, kind: output, shape index: {}]  }
   0x1   :  { %1861 = sst [smem:[#allocation8_spill]] %s1843_s0  ;;  %s1632_s15 = smov 0  }
   0x2   :  { %1862 = sst [smem:[#allocation9_spill]] %s1844_s1  ;;  %s1634_s16 = smov 0  }
   0x3   :  { %1863 = sst [smem:[#allocation10_spill]] %s1845_s2  ;;  %s1636_s17 = smov 0  }
   0x4   :  { %1864 = sst [smem:[#allocation11_spill]] %s1847_s4 }
   0x5   :  { %1865 = sst [smem:[#allocation12_spill]] %s1852_s9 }
   0x6   :  { %1866 = sst [smem:[#allocation13_spill]] %s1854_s11 }
   0x7   :  { %1867 = sst [smem:[#allocation14_spill]] %s1855_s12 }
   0x8   :  { %1868 = sst [smem:[#allocation15_spill]] %s1856_s13 }
   0x9 LB: > { %1869 = sst [smem:[#allocation3_spill]] %s1540_s15  ;;  %s33_s18 = sadd.s32 1, %s1540_s15  ;;  %s1548_s17 = sphi %s1636_s17, %s24_s17   ;;  %s1544_s16 = sphi %s1634_s16, %s1889_s16   ;;  %s1540_s15 = sphi %s1632_s15, %s1888_s15   ;;  %s1536_s30 = sphi %s1630_s30, %s1887_s30   ;;  %s1532_s29 = sphi %s1628_s29, %s1886_s29  }
   0xa   : > { %1870 = sst [smem:[#allocation4_spill]] %s1544_s16  ;;  %s36_s19 = sadd.s32 1, %s1544_s16 }
   0xb   : > { %1871 = sst [smem:[#allocation5_spill]] %s1548_s17  ;;  %p34_p0 = scmp.ge.s32.totalorder %s33_s18, 8 }
   0xc   : > { %p1319_p1 = scmp.ge.s32.totalorder %s1548_s17, 1  ;;  %p505_p2 = scmp.lt.s32.totalorder %s1548_s17, 17 }
   0xd   : > { %s1891_s18 = smov (%p34_p0, %s33_s18), 0  ;;  %s1893_s19 = smov (!%p34_p0, %s36_s19), %s1544_s16 }
   0xe   : > { %1872 = sst [smem:[#allocation6_spill]] %s1891_s18  ;;  %p506_p3 = pnand %p1319_p1, %p505_p2 }
   0xf   : > { %p38_p4 = scmp.ge.s32.totalorder %s1893_s19, 2  ;;  %p587_p5 = scmp.lt.s32.totalorder (!%p506_p3), %s1536_s30, 1 }
  0x10   : > { %509 = sbr.rel (%p506_p3) target bundleno = 1571 (0x623), region = 76  ;;  %p597_p6 = scmp.lt.s32.totalorder (!%p506_p3), %s1532_s29, 7 }
  0x11   : > { %s1895_s19 = smov (%p38_p4, %s1893_s19), 0  ;;  %s1875_s0 = sld [smem:[#allocation8_spill]] (!%p506_p3) }
  0x12   : > { %1873 = sst [smem:[#allocation7_spill]] %s1895_s19  ;;  %s1876_s1 = sld [smem:[#allocation9_spill]] (!%p506_p3) }
  0x13   : > { %s1877_s2 = sld [smem:[#allocation10_spill]] (!%p506_p3)  ;;  %s1878_s4 = sld [smem:[#allocation11_spill]] (!%p506_p3) }
  0x14   : > { %p1333_p7 = scmp.ne.s32.totalorder (!%p506_p3), %s1532_s29, 0 }
  0x17   : > { %s1897_s30 = smov (!%p587_p5, %s1536_s30), 1  ;;  %vm638_vm0 = vcmask (!%p1333_p7), 523264   ;;  %vm640_vm1 = vcmask (!%p1333_p7), 517120   ;;  %v1550_v0 = vmov (!%p1333_p7), 0.0  }
  0x18   : > { %s1664_s20 = scalar_select %p597_p6, %s1532_s29, 7 }
  0x19   : > { %s1362_s21 = sshll.u32 %s1897_s30, 4  ;;  %637 = sbr.rel (%p1333_p7) target bundleno = 32 (0x20), region = 80  ;;  %639 = vst.msk [vmem:[#allocation2] sm:$0xff] (!%p1333_p7), %vm638_vm0, %v1550_v0 }
  0x1a   : > { %s1674_s27 = scalar_lea.vmem %s1875_s0, %s1362_s21  ;;  %s1679_s18 = scalar_lea.vmem %s1876_s1, %s1362_s21  ;;  %641 = vst.msk [vmem:[#allocation2 + $0x8] sm:$0x3] (!%p1333_p7), %vm640_vm1, %v1550_v0 }
  0x1b   : > { %s1364_s16 = sshll.u32 %s1664_s20, 5  ;;  %s612_s19 = scalar_lea.vmem %s1848_s5, %s1664_s20 }
  0x1c   : > { %s1689_s22 = scalar_lea.vmem %s1877_s2, %s1364_s16  ;;  %s1694_s25 = scalar_lea.vmem %s1878_s4, %s1364_s16 }
  0x1d   : > { %s1703_s11 = scalar_lea.vmem %s1849_s6, %s1364_s16  ;;  %s620_s9 = scalar_lea.vmem %s1850_s7, %s1664_s20 }
  0x1e   : > { %s1330_s12 = sshll.u32 %s1664_s20, 2  ;;  %s1718_s0 = scalar_lea.vmem %s1857_s14, %s1362_s21 }
  0x1f   : > { %s1713_s24 = scalar_lea.vmem %s1851_s8, %s1330_s12 }
  0x20 PF: > { %v1486_v1 = vld [vmem:[%s1694_s25] sm:$0xff]   ;;  %v1551_v2 = vmov 0.0   ;;  %v1488_v4 = vld [vmem:[%s1694_s25 + $0x8] sm:$0xff]   ;;  %vm1552_vm2 = vmmov 0   ;;  %v1490_v6 = vld [vmem:[%s1694_s25 + $0x10] sm:$0xff]   ;;  %vm687_vm3 = vcmask 523264   ;;  %s1879_s4 = scalar_lea.vmem %s1846_s3, %s1664_s20 }
  0x21   : > { %1401 = vmatprep.subr.bf16.mxu1 %v1551_v2  ;;  %1389 = vmatprep.subr.bf16.mxu0 %v1551_v2  ;;  %v1487_v3 = vld [vmem:[%s1689_s22] sm:$0xff]   ;;  %v1489_v5 = vld [vmem:[%s1689_s22 + $0x8] sm:$0xff]   ;;  %v1491_v7 = vld [vmem:[%s1689_s22 + $0x10] sm:$0xff]   ;;  %vm901_vm4 = vcmask 64512   ;;  %s1880_s26 = sld [smem:[#allocation13_spill]]  ;;  %vm958_vm5 = vcmask 80896  }
  0x22   : > { %1402 = vmatpush3.bf16.msra.mxu1 %v1486_v1  ;;  %1409 = vmatprep.mubr.msk.bf16.mxu1 %vm1552_vm2, %v1551_v2  ;;  %v1492_v8 = vld [vmem:[%s1694_s25 + $0x18] sm:$0xff]   ;;  %v644_v9 = vld [vmem:[%s1679_s18] sm:$0xff]  ;;  %v645_v10 = vld [vmem:[%s1679_s18 + $0x8] sm:$0x3]  ;;  %vm962_vm6 = vcmask 74752   ;;  %vm987_vm7 = vcmask 1044480  }
  0x23   : > { %1403 = vmatprep.subr.bf16.mxu1 %v1551_v2  ;;  %1390 = vmatpush3.bf16.msra.mxu0 %v1487_v3  ;;  %v1493_v11 = vld [vmem:[%s1689_s22 + $0x18] sm:$0xff]   ;;  %v1742_v12 = vld [vmem:[%s1674_s27] sm:$0xff]  ;;  %v1745_v13 = vld [vmem:[%s1674_s27 + $0x8] sm:$0x3]  ;;  %v647_v14 = vpack.c.bf16 %v645_v10, %v644_v9  ;;  %vm1039_vm8 = vcmask 1043456   ;;  %vm1087_vm9 = vcmask 517120  }
  0x24   : > { %1391 = vmatprep.subr.bf16.mxu0 %v1551_v2  ;;  %1397 = vmatprep.mubr.msk.bf16.mxu0 %vm1552_vm2, %v1551_v2  ;;  %v646_v15 = vpack.c.bf16 %v1745_v13, %v1742_v12  ;;  %v1334_v16 = vld [vmem:[%s1879_s4] ss:$0 sm:$0xff]  ;;  %v1495_v36 = vld [vmem:[%s1703_s11 + $0x8] sm:$0xff]   ;;  %v1496_v37 = vld [vmem:[%s1703_s11 + $0x10] sm:$0xff]   ;;  %p1356_p8 = scmp.ne.s32.totalorder %s1532_s29, 7 }
  0x25   : > { %v1340_v17 = vld [vmem:[%s612_s19] ss:$0 sm:$0xff]  ;;  %v1497_v38 = vld [vmem:[%s1703_s11 + $0x18] sm:$0xff]   ;;  %v900_v41 = vld [vmem:[%s1853_s10 + $0x8] sm:$0x3]  ;;  %s1882_s17 = sld [smem:[#allocation12_spill]] (!%p1356_p8) }
  0x26   : > { %1404 = vmatpush3.bf16.msra.mxu1 %v1488_v4  ;;  %v1494_v35 = vld [vmem:[%s1703_s11] sm:$0xff]   ;;  %s1883_s12 = sld [smem:[#allocation14_spill]] (!%p1356_p8)  ;;  %s1884_s1 = sld [smem:[#allocation15_spill]] (!%p1356_p8) }
  0x27   : > { %1405 = vmatprep.subr.bf16.mxu1 %v1551_v2  ;;  %1392 = vmatpush3.bf16.msra.mxu0 %v1489_v5  ;;  %v899_v39 = vld [vmem:[%s1853_s10] sm:$0xff]  ;;  %s1881_s19 = scalar_lea.vmem %s1880_s26, %s1897_s30 }
  0x28   : > { %1393 = vmatprep.subr.bf16.mxu0 %v1551_v2  ;;  %v1353_v42 = vld [vmem:[%s1881_s19] ss:$0 sm:$0xff] }
  0x29   : > { %v1346_v1 = vld [vmem:[%s620_s9] ss:$0 sm:$0xff] }
  0x2a   : > { %1406 = vmatpush3.bf16.msra.mxu1 %v1490_v6 }
  0x2b   : > { %1407 = vmatprep.subr.bf16.mxu1 %v1551_v2  ;;  %1394 = vmatpush3.bf16.msra.mxu0 %v1491_v7  ;;  %v1035_v7 = vld [vmem:[%s1713_s24] sm:$0xf] }
  0x2c   : > { %1395 = vmatprep.subr.bf16.mxu0 %v1551_v2 }
  0x2e   : > { %1408 = vmatpush3.bf16.msra.mxu1 %v1492_v8  ;;  %v1041_v8 = vsel %vm1039_vm8, %v1035_v7, 0 }
  0x2f   : > { %1396 = vmatpush3.bf16.msra.mxu0 %v1493_v11  ;;  %1425 = vmatprep.subr.bf16.mxu1 %v1551_v2 }
  0x30   : > { %1413 = vmatprep.subr.bf16.mxu0 %v1551_v2 }
  0x31   : > { %1410 = vmatmul.mubr.msk.bf16.vlgmr.msra.gmra.mrb[0].mxu1 %vm687_vm3, %v647_v14 }
  0x32   : > { %1398 = vmatmul.mubr.msk.bf16.vlgmr.msra.gmra.mrb[0].mxu0 %vm687_vm3, %v646_v15  ;;  %1427 = vmatprep.mubr.msk.bf16.mxu1 %vm1552_vm2, %v1551_v2 }
  0x33   : > { %1421 = vmatprep.mubr.msk.bf16.mxu0 %vm1552_vm2, %v1551_v2  ;;  %1414 = vmatpush3.bf16.msra.mxu0 %v1494_v35 }
  0x34   : > { %1415 = vmatprep.subr.bf16.mxu0 %v1551_v2 }
  0x37   : > { %1416 = vmatpush3.bf16.msra.mxu0 %v1495_v36 }
  0x38   : > { %1417 = vmatprep.subr.bf16.mxu0 %v1551_v2 }
  0x3b   : > { %1418 = vmatpush3.bf16.msra.mxu0 %v1496_v37 }
  0x3c   : > { %1419 = vmatprep.subr.bf16.mxu0 %v1551_v2 }
  0x3f   : > { %1420 = vmatpush3.bf16.msra.mxu0 %v1497_v38 }
  0x40   : > { %1437 = vmatprep.subr.bf16.mxu0 %v1551_v2 }
  0x42   : > { %1422 = vmatmul.mubr.msk.bf16.vlgmr.msra.gmra.mrb[4].mxu0 %vm687_vm3, %v647_v14 }
  0x43   : > { %1439 = vmatprep.mubr.msk.bf16.mxu0 %vm1552_vm2, %v1551_v2  ;;  %1438 = vmatpush3.bf16.msra.mxu0 %v1041_v8 }
 0x104   : > { %v808_v18 = vpop.f32.mrb[0].mxu1 }
 0x105   : > { %v1411_v19 = vpop.f32.mrb[1].mxu1  ;;  %v725_v20 = vpop.f32.mrb[0].mxu0  ;;  %v809_v24 = vadd.f32 %v1340_v17, %v808_v18 }
 0x106   : > { %v811_v21 = vpop.f32.mrb[2].mxu1  ;;  %v726_v22 = vadd.f32 %v1334_v16, %v725_v20  ;;  %v1399_v23 = vpop.f32.mrb[1].mxu0 }
 0x107   : > { %v812_v25 = vadd.f32 %v1340_v17, %v811_v21  ;;  %v1412_v26 = vpop.f32.mrb[3].mxu1  ;;  %v728_v27 = vpop.f32.mrb[2].mxu0  ;;  %v1032_v23 = vld [vmem:[#allocation2] sm:$0xff] }
 0x108   : > { %v895_v28 = vmul.f32 0.35355338, %v726_v22  ;;  %v729_v29 = vadd.f32 %v1334_v16, %v728_v27  ;;  %v1400_v30 = vpop.f32.mrb[3].mxu0 }
 0x109   : > { %v898_v31 = vpack.c.bf16 %v812_v25, %v809_v24  ;;  %v1033_v25 = vld [vmem:[#allocation2 + $0x8] sm:$0x3] }
 0x10a   : > { %v896_v32 = vmul.f32 0.35355338, %v729_v29 }
 0x10b   : > { %v906_v33 = vsel %vm901_vm4, %v898_v31, 0 }
 0x10c   : > { %v897_v34 = vpack.c.bf16 %v896_v32, %v895_v28  ;;  %1426 = vmatpush3.bf16.xpose.msra.mxu1 %v906_v33  ;;  %v1357_v32 = vld [vmem:[%s1882_s17] ss:$0 sm:$0xff] (!%p1356_p8) }
 0x10d   : > { %1431 = vmatprep.subr.bf16.mxu1 %v1551_v2 }
 0x113   : > { %1428 = vmatmul.mubr.msk.bf16.vlgmr.msra.gmra.mrb[4].mxu1 %vm901_vm4, %v897_v34 }
 0x114   : > { %1433 = vmatprep.mubr.msk.bf16.mxu1 %vm1552_vm2, %v1551_v2 }
 0x115   : > { %v888_v62 = vpop.f32.mrb[4].mxu0 }
 0x116   : > { %v1423_v63 = vpop.f32.mrb[5].mxu0  ;;  %v889_v3 = vadd.f32 %v1346_v1, %v888_v62 }
 0x117   : > { %v891_v0 = vpop.f32.mrb[6].mxu0 }
 0x118   : > { %v1424_v2 = vpop.f32.mrb[7].mxu0  ;;  %v892_v4 = vadd.f32 %v1346_v1, %v891_v0 }
 0x11a   : > { %v983_v5 = vpack.c.bf16 %v892_v4, %v889_v3 }
 0x11c   : > { %v989_v6 = vsel %vm987_vm7, %v983_v5, 0 }
 0x11d   : > { %1432 = vmatpush3.bf16.msra.mxu1 %v989_v6 }
 0x1e6   : > { %v942_v40 = vpop.f32.mrb[4].mxu1 }
 0x1e7   : > { %v943_v43 = vadd.f32 %v942_v40, %v899_v39  ;;  %v1429_v44 = vpop.f32.mrb[5].mxu1 }
 0x1e8   : > { %v945_v45 = vpop.f32.mrb[6].mxu1 }
 0x1e9   : > { %v946_v46 = vadd.f32 %v945_v45, %v900_v41  ;;  %v1430_v47 = vpop.f32.mrb[7].mxu1  ;;  %v956_v48 = vadd.f32 %v1353_v42, %v943_v43 }
 0x1eb   : > { %v959_v49 = vsel %vm958_vm5, %v956_v48, -inf  ;;  %v957_v50 = vadd.f32 %v1353_v42, %v946_v46 }
 0x1ec   : > { %960 = vmax.xlane.f32.xlu0 %v959_v49 }
 0x1ed   : > { %v963_v51 = vsel %vm962_vm6, %v957_v50, -inf }
 0x1f0   : > { %964 = vmax.xlane.f32.xlu0 %v963_v51 }
 0x279   : > { %v961_v52 = vpop.xlane.xlu0 %960 }
 0x27a   : > { %v966_v53 = vsub.f32 %v956_v48, %v961_v52 }
 0x27c   : > { %v968_v54 = vmul.f32 1.442695, %v966_v53 }
 0x27d   : > { %v965_v55 = vpop.xlane.xlu0 %964 }
 0x27e   : > { %1498 = vpow2.f32 %v968_v54  ;;  %v967_v56 = vsub.f32 %v957_v50, %v965_v55  ;;  %v1358_v55 = vld [vmem:[%s1883_s12] ss:$0 sm:$0xff] (!%p1356_p8) }
 0x280   : > { %v970_v57 = vmul.f32 1.442695, %v967_v56 }
 0x282   : > { %1500 = vpow2.f32 %v970_v57  ;;  %v1359_v57 = vld [vmem:[%s1884_s1] ss:$0 sm:$0xff] (!%p1356_p8) }
 0x288   : > { %v1499_v58 = vpop.eup %1498 }
 0x289   : > { %v972_v59 = vsel %vm958_vm5, %v1499_v58, 0.0 }
 0x28a   : > { %973 = vadd.xlane.f32.xlu1 %v972_v59 }
 0x28c   : > { %v1501_v60 = vpop.eup %1500 }
 0x28d   : > { %v975_v61 = vsel %vm962_vm6, %v1501_v60, 0.0 }
 0x28e   : > { %976 = vadd.xlane.f32.xlu1 %v975_v61 }
 0x317   : > { %v974_v9 = vpop.xlane.xlu1 %973 }
 0x318   : > { %1502 = vrcp.f32 %v974_v9 }
 0x31b   : > { %v977_v10 = vpop.xlane.xlu1 %976 }
 0x31c   : > { %1504 = vrcp.f32 %v977_v10 }
 0x322   : > { %v1503_v11 = vpop.eup %1502 }
 0x323   : > { %v980_v15 = vmul.f32 %v1503_v11, %v1499_v58 }
 0x326   : > { %v1505_v14 = vpop.eup %1504 }
 0x327   : > { %v981_v16 = vmul.f32 %v1505_v14, %v1501_v60 }
 0x329   : > { %v982_v17 = vpack.c.bf16 %v981_v16, %v980_v15 }
 0x32b   : > { %1434 = vmatmul.mubr.msk.bf16.vlgmr.msra.gmra.mrb[8].mxu1 %vm958_vm5, %v982_v17 }
 0x3fe   : > { %v1025_v18 = vpop.f32.mrb[8].mxu1 }
 0x3ff   : > { %v1435_v19 = vpop.f32.mrb[9].mxu1 }
 0x400   : > { %v1028_v20 = vpop.f32.mrb[10].mxu1 }
 0x401   : > { %v1034_v21 = vpack.c.bf16 %v1028_v20, %v1025_v18  ;;  %v1436_v22 = vpop.f32.mrb[11].mxu1 }
 0x403   : > { %1440 = vmatmul.mubr.msk.bf16.vlgmr.msra.gmra.mrb[8].mxu0 %vm901_vm4, %v1034_v21 }
 0x4d5   : > { %1092 = sbr.rel (%p1356_p8) target bundleno = 1571 (0x623), region = 84 }
 0x4d6   : > { %v1077_v24 = vpop.f32.mrb[8].mxu0 }
 0x4d7   : > { %v1084_v26 = vadd.f32 %v1077_v24, %v1032_v23  ;;  %v1441_v27 = vpop.f32.mrb[9].mxu0 }
 0x4d8   : > { %v1080_v28 = vpop.f32.mrb[10].mxu0 }
 0x4d9   : > { %1086 = vst.msk [vmem:[#allocation2] sm:$0xff] %vm687_vm3, %v1084_v26  ;;  %v1085_v29 = vadd.f32 %v1080_v28, %v1033_v25  ;;  %v1442_v30 = vpop.f32.mrb[11].mxu0 }
 0x4db   : > { %1088 = vst.msk [vmem:[#allocation2 + $0x8] sm:$0x3] %vm1087_vm9, %v1085_v29 }
 0x4e0   : > { %v1093_v31 = vld [vmem:[#allocation2] sm:$0xff] }
 0x4e1   : > { %v1102_v34 = vadd.f32 %v1357_v32, %v1093_v31 }
 0x4e2   : > { %v1094_v33 = vld [vmem:[#allocation2 + $0x8] sm:$0x3] }
 0x4e3   : > { %v1103_v35 = vadd.f32 %v1357_v32, %v1094_v33  ;;  %v1104_v36 = vadd.f32 %v1102_v34, %v1742_v12 }
 0x4e5   : > { %v1105_v37 = vadd.f32 %v1103_v35, %v1745_v13  ;;  %v1106_v38 = vsel %vm687_vm3, %v1104_v36, 0.0 }
 0x4e6   : > { %1107 = vadd.xlane.f32.xlu0 %v1106_v38 }
 0x4e7   : > { %v1109_v39 = vsel %vm1087_vm9, %v1105_v37, 0.0 }
 0x4ea   : > { %1110 = vadd.xlane.f32.xlu0 %v1109_v39 }
 0x573   : > { %v1108_v40 = vpop.xlane.xlu0 %1107 }
 0x574   : > { %v1113_v41 = vmul.f32 0.015625, %v1108_v40 }
 0x576   : > { %v1115_v42 = vsub.f32 %v1104_v36, %v1113_v41 }
 0x577   : > { %v1111_v43 = vpop.xlane.xlu0 %1110 }
 0x578   : > { %v1114_v44 = vmul.f32 0.015625, %v1111_v43  ;;  %v1117_v45 = vmul.f32 %v1115_v42, %v1115_v42 }
 0x57a   : > { %v1116_v46 = vsub.f32 %v1105_v37, %v1114_v44  ;;  %v1119_v47 = vsel %vm687_vm3, %v1117_v45, 0.0 }
 0x57b   : > { %1120 = vadd.xlane.f32.xlu1 %v1119_v47 }
 0x57c   : > { %v1118_v48 = vmul.f32 %v1116_v46, %v1116_v46 }
 0x57e   : > { %v1122_v12 = vsel %vm1087_vm9, %v1118_v48, 0.0 }
 0x57f   : > { %1123 = vadd.xlane.f32.xlu1 %v1122_v12 }
 0x608   : > { %v1121_v13 = vpop.xlane.xlu1 %1120 }
 0x609   : > { %v1125_v49 = vmul.f32 0.015625, %v1121_v13 }
 0x60b   : > { %v1127_v50 = vadd.f32 1e-05, %v1125_v49 }
 0x60c   : > { %v1124_v51 = vpop.xlane.xlu1 %1123 }
 0x60d   : > { %1506 = vrsqrt.f32 %v1127_v50  ;;  %v1126_v52 = vmul.f32 0.015625, %v1124_v51 }
 0x60f   : > { %v1128_v53 = vadd.f32 1e-05, %v1126_v52 }
 0x611   : > { %1508 = vrsqrt.f32 %v1128_v53 }
 0x617   : > { %v1507_v54 = vpop.eup %1506 }
 0x618   : > { %v1131_v56 = vmul.f32 %v1507_v54, %v1115_v42 }
 0x61a   : > { %v1140_v58 = vmul.f32 %v1358_v55, %v1131_v56 }
 0x61b   : > { %v1509_v59 = vpop.eup %1508 }
 0x61c   : > { %v1149_v60 = vadd.f32 %v1359_v57, %v1140_v58  ;;  %v1132_v61 = vmul.f32 %v1509_v59, %v1116_v46 }
 0x61e   : > { %1151 = vst.msk [vmem:[%s1718_s0] sm:$0xff] %vm687_vm3, %v1149_v60  ;;  %v1141_v62 = vmul.f32 %v1358_v55, %v1132_v61 }
 0x620   : > { %v1150_v63 = vadd.f32 %v1359_v57, %v1141_v62 }
 0x622   : > { %1152 = vst.msk [vmem:[%s1718_s0 + $0x8] sm:$0x3] %vm1087_vm9, %v1150_v63 }
 0x623 PF: > { %s1885_s2 = sld [smem:[#allocation5_spill]]  ;;  %s1886_s29 = sld [smem:[#allocation3_spill]] }
 0x624   : > { %s1887_s30 = sld [smem:[#allocation4_spill]]  ;;  %s1888_s15 = sld [smem:[#allocation6_spill]] }
 0x625   : > { %s1889_s16 = sld [smem:[#allocation7_spill]] }
 0x629   : > { %s24_s17 = sadd.s32 1, %s1885_s2  }
 0x62a   : > { %p21_p9 = scmp.ge.s32.totalorder %s24_s17, 18  }
 0x62c   :  { %23 = sbr.rel (!%p21_p9) target bundleno = 9 (0x9), region = 141 }

</bundles_post_ra>
